<compile_context>
chip_gen: v7x
topology: tpu7x:2x2x1
jax: 0.10.0
libtpu: 0.0.40
codegen_flags: <defaults>
</compile_context>

<pallas_src>
import functools

import jax
import jax.numpy as jnp
from jax import lax
from jax.experimental import pallas as pl
from jax.experimental.pallas import tpu as pltpu


def _round_up(x, m):
    return ((x + m - 1) // m) * m


def _num_tensorcores():
    """TensorCores a single pallas_call can shard a 'parallel' axis across."""
    try:
        info = pltpu.get_tpu_info()
    except Exception:
        return 1
    for attr in ("num_cores", "core_count", "num_tensorcores",
                 "tensorcores_per_chip", "cores_per_chip"):
        val = getattr(info, attr, None)
        if isinstance(val, int) and val > 0:
            return val
    return 1


def multiplied_fn_kernel(x_ref, w1_ref, b1_ref, w2_ref, b2_ref, o_ref, *, precision):
    """Evaluate fun1(points) * fun2(points) for one tile of rows.

    x_ref  : (tm, D)  tile of points
    wi_ref : (D, O)   weights of fun_i (resident across the grid)
    bi_ref : (1, O)   bias of fun_i
    o_ref  : (tm, O)  output tile
    """
    x = x_ref[...]
    # Two dots sharing the same x operand (instead of a fused [W1|W2]): avoids
    # the per-call weight concat in the wrapper and the cross-lane y[:, O:]
    # split in-kernel.  Rows are independent, so ragged boundary rows are safe.
    y1 = jnp.dot(x, w1_ref[...], preferred_element_type=jnp.float32,
                 precision=precision) + b1_ref[...]
    y2 = jnp.dot(x, w2_ref[...], preferred_element_type=jnp.float32,
                 precision=precision) + b2_ref[...]
    o_ref[...] = (y1 * y2).astype(o_ref.dtype)


def multiplied_function(points, w1, b1, w2, b2, *,
                        tile_vmem_budget_bytes=6 << 20,
                        compute_dtype=None):
    """MultipliedFunction.build_evaluation: (x @ W1 + b1) * (x @ W2 + b2)."""
    n, d = points.shape
    o = w1.shape[1]
    b1 = jnp.asarray(b1, jnp.float32).reshape(1, o)
    b2 = jnp.asarray(b2, jnp.float32).reshape(1, o)

    if compute_dtype is not None:
        # bf16 storage for the memory-bound operands; accumulation and the
        # elementwise multiply stay in f32.
        points = points.astype(compute_dtype)
        w1 = w1.astype(compute_dtype)
        w2 = w2.astype(compute_dtype)
        precision = None
    else:
        # Keep the f32 reference semantics (DEFAULT may lower to lossy bf16
        # MXU passes).
        precision = lax.Precision.HIGHEST

    x_item = points.dtype.itemsize
    w_item = w1.dtype.itemsize

    # --- Row tile sized by lane-padded VMEM bytes, not rows. ----------------
    lane_d = _round_up(d, 128)
    lane_o = _round_up(o, 128)
    bytes_per_row = 2 * lane_d * x_item + 2 * lane_o * 4   # dbl-buffered x + out
    tm = max(8, (tile_vmem_budget_bytes // bytes_per_row) // 8 * 8)
    tm = min(tm, _round_up(n, 8))                           # never bigger than N

    # --- Split the grid for megacore only when it can actually help. --------
    cores = _num_tensorcores()
    if cores > 1 and n >= cores * 1024:
        per_core = _round_up(-(-n // cores), 8)
        tm = min(tm, per_core)

    grid_m = pl.cdiv(n, tm)   # ragged last block handled by Pallas (no pad/slice)

    # --- Constant-index weight/bias specs: single-buffer once they matter. --
    single_buffer = (d * o * w_item) >= (1 << 20)

    def _const_spec(shape):
        if single_buffer:
            return pl.BlockSpec(shape, lambda i: (0, 0),
                                pipeline_mode=pl.Buffered(1))
        return pl.BlockSpec(shape, lambda i: (0, 0))

    # --- VMEM-limit estimate (lane/sublane padded, 2x headroom). ------------
    w_bufs = 1 if single_buffer else 2
    needed = (2 * tm * lane_d * x_item                       # x double buffer
              + 2 * tm * lane_o * 4                          # out double buffer
              + w_bufs * 2 * _round_up(d, 8) * lane_o * w_item   # W1 + W2
              + w_bufs * 2 * 8 * lane_o * 4)                 # b1 + b2
    vmem_limit = int(min(96 << 20, max(16 << 20, 2 * needed)))

    flops = 2 * (2 * n * d * o) + 3 * n * o
    bytes_accessed = (n * d * x_item + 2 * d * o * w_item + 2 * o * 4
                      + n * o * 4)

    return pl.pallas_call(
        functools.partial(multiplied_fn_kernel, precision=precision),
        out_shape=jax.ShapeDtypeStruct((n, o), jnp.float32),
        grid_spec=pltpu.PrefetchScalarGridSpec(
            num_scalar_prefetch=0,
            grid=(grid_m,),
            in_specs=[
                pl.BlockSpec((tm, d), lambda i: (i, 0)),     # points tile
                _const_spec((d, o)),                         # W1 (resident)
                _const_spec((1, o)),                         # b1
                _const_spec((d, o)),                         # W2 (resident)
                _const_spec((1, o)),                         # b2
            ],
            out_specs=pl.BlockSpec((tm, o), lambda i: (i, 0)),
        ),
        compiler_params=pltpu.CompilerParams(
            dimension_semantics=("parallel",),
            vmem_limit_bytes=vmem_limit,
        ),
        cost_estimate=pl.CostEstimate(
            flops=flops, transcendentals=0, bytes_accessed=bytes_accessed),
    )(points, w1, b1, w2, b2)


if __name__ == "__main__":
    # Small, deterministic problem: 128 points of dimension 32, 16 outputs.
    N, D, O = 128, 32, 16
    key = jax.random.PRNGKey(0)
    k_x, k_w1, k_b1, k_w2, k_b2 = jax.random.split(key, 5)

    points = jax.random.normal(k_x, (N, D), dtype=jnp.float32)
    w1 = jax.random.normal(k_w1, (D, O), dtype=jnp.float32) * 0.1
    b1 = jax.random.normal(k_b1, (O,), dtype=jnp.float32) * 0.1
    w2 = jax.random.normal(k_w2, (D, O), dtype=jnp.float32) * 0.1
    b2 = jax.random.normal(k_b2, (O,), dtype=jnp.float32) * 0.1

    out = jax.block_until_ready(multiplied_function(points, w1, b1, w2, b2))

    # Pure-JAX reference of MultipliedFunction.build_evaluation.
    ref = (points @ w1 + b1) * (points @ w2 + b2)
    assert out.shape == (N, O)
    assert jnp.allclose(out, ref, atol=1e-5, rtol=1e-5), "mismatch vs reference"

    # Ragged row count exercises the cdiv grid + Pallas boundary handling
    # (no wrapper pad / slice round-trip anymore).
    points_r = points[:100]
    out_r = jax.block_until_ready(multiplied_function(points_r, w1, b1, w2, b2))
    ref_r = (points_r @ w1 + b1) * (points_r @ w2 + b2)
    assert out_r.shape == (100, O)
    assert jnp.allclose(out_r, ref_r, atol=1e-5, rtol=1e-5), "ragged mismatch"

    # bf16 storage variant (f32 accumulation + f32 multiply), looser tolerance.
    out_bf16 = jax.block_until_ready(
        multiplied_function(points, w1, b1, w2, b2, compute_dtype=jnp.bfloat16))
    assert out_bf16.shape == (N, O)
    assert jnp.allclose(out_bf16, ref, atol=5e-2, rtol=5e-2), "bf16 mismatch"

    # NOTE: MultipliedFunction.forward() in the source returns self.constant,
    # which is undefined on this class (inherited dead code); the meaningful
    # forward pass is build_evaluation, implemented above.

    print("KERNEL_OK")
</pallas_src>

<mosaic_0001>
module attributes {stable_mosaic.version = 11 : i64} {
  func.func @multiplied_fn_kernel(%arg0: i32, %arg1: memref<128x32xf32, #tpu.memory_space<vmem>>, %arg2: memref<32x16xf32, #tpu.memory_space<vmem>>, %arg3: memref<1x16xf32, #tpu.memory_space<vmem>>, %arg4: memref<32x16xf32, #tpu.memory_space<vmem>>, %arg5: memref<1x16xf32, #tpu.memory_space<vmem>>, %arg6: memref<128x16xf32, #tpu.memory_space<vmem>>) attributes {dimension_semantics = [#tpu.dimension_semantics<parallel>], iteration_bounds = array<i64: 1>, scalar_prefetch = 0 : i64, scratch_operands = 0 : i64, tpu.core_type = #tpu.core_type<tc>, window_params = [{transform_indices = @transform_0, window_bounds = array<i64: 128, 32>}, {pipeline_mode = #tpu.pipeline_mode<synchronous>, transform_indices = @transform_1, window_bounds = array<i64: 32, 16>}, {pipeline_mode = #tpu.pipeline_mode<synchronous>, transform_indices = @transform_2, window_bounds = array<i64: 1, 16>}, {pipeline_mode = #tpu.pipeline_mode<synchronous>, transform_indices = @transform_3, window_bounds = array<i64: 32, 16>}, {pipeline_mode = #tpu.pipeline_mode<synchronous>, transform_indices = @transform_4, window_bounds = array<i64: 1, 16>}, {transform_indices = @transform_5, window_bounds = array<i64: 128, 16>}]} {
    %c0 = arith.constant 0 : index
    %c0_0 = arith.constant 0 : index
    %0 = vector.load %arg1[%c0, %c0_0] : memref<128x32xf32, #tpu.memory_space<vmem>>, vector<128x32xf32>
    %c0_1 = arith.constant 0 : index
    %c0_2 = arith.constant 0 : index
    %1 = vector.load %arg2[%c0_1, %c0_2] : memref<32x16xf32, #tpu.memory_space<vmem>>, vector<32x16xf32>
    %cst = arith.constant dense<0.000000e+00> : vector<128x16xf32>
    %2 = tpu.matmul %0, %1, %cst {dimension_numbers = #tpu.dot_dimension_numbers<[1], [0], [0], [1], [0, 0, 1, 1], [], []>, precision = #tpu.contract_precision<fp32>} : vector<128x32xf32>, vector<32x16xf32>, vector<128x16xf32> -> vector<128x16xf32>
    %c0_3 = arith.constant 0 : index
    %c0_4 = arith.constant 0 : index
    %3 = vector.load %arg3[%c0_3, %c0_4] : memref<1x16xf32, #tpu.memory_space<vmem>>, vector<1x16xf32>
    %4 = vector.broadcast %3 : vector<1x16xf32> to vector<128x16xf32>
    %5 = arith.addf %2, %4 : vector<128x16xf32>
    %c0_5 = arith.constant 0 : index
    %c0_6 = arith.constant 0 : index
    %6 = vector.load %arg4[%c0_5, %c0_6] : memref<32x16xf32, #tpu.memory_space<vmem>>, vector<32x16xf32>
    %cst_7 = arith.constant dense<0.000000e+00> : vector<128x16xf32>
    %7 = tpu.matmul %0, %6, %cst_7 {dimension_numbers = #tpu.dot_dimension_numbers<[1], [0], [0], [1], [0, 0, 1, 1], [], []>, precision = #tpu.contract_precision<fp32>} : vector<128x32xf32>, vector<32x16xf32>, vector<128x16xf32> -> vector<128x16xf32>
    %c0_8 = arith.constant 0 : index
    %c0_9 = arith.constant 0 : index
    %8 = vector.load %arg5[%c0_8, %c0_9] : memref<1x16xf32, #tpu.memory_space<vmem>>, vector<1x16xf32>
    %9 = vector.broadcast %8 : vector<1x16xf32> to vector<128x16xf32>
    %10 = arith.addf %7, %9 : vector<128x16xf32>
    %11 = arith.mulf %5, %10 : vector<128x16xf32>
    %c0_10 = arith.constant 0 : index
    %c0_11 = arith.constant 0 : index
    %12 = vector.load %arg6[%c0_10, %c0_11] : memref<128x16xf32, #tpu.memory_space<vmem>>, vector<128x16xf32>
    tpu.vector_store %arg6[%c0_10, %c0_11], %11 {strides = array<i32>} : memref<128x16xf32, #tpu.memory_space<vmem>>, vector<128x16xf32>,
    return
  }
  func.func @transform_0(%arg0: i32) -> (i32, i32) {
    %c0_i32 = arith.constant 0 : i32
    %c0_i32_0 = arith.constant 0 : i32
    return %arg0, %c0_i32 : i32, i32
  }
  func.func @transform_1(%arg0: i32) -> (i32, i32) {
    %c0_i32 = arith.constant 0 : i32
    %c0_i32_0 = arith.constant 0 : i32
    %c0_i32_1 = arith.constant 0 : i32
    return %c0_i32, %c0_i32_0 : i32, i32
  }
  func.func @transform_2(%arg0: i32) -> (i32, i32) {
    %c0_i32 = arith.constant 0 : i32
    %c0_i32_0 = arith.constant 0 : i32
    %c0_i32_1 = arith.constant 0 : i32
    return %c0_i32, %c0_i32_0 : i32, i32
  }
  func.func @transform_3(%arg0: i32) -> (i32, i32) {
    %c0_i32 = arith.constant 0 : i32
    %c0_i32_0 = arith.constant 0 : i32
    %c0_i32_1 = arith.constant 0 : i32
    return %c0_i32, %c0_i32_0 : i32, i32
  }
  func.func @transform_4(%arg0: i32) -> (i32, i32) {
    %c0_i32 = arith.constant 0 : i32
    %c0_i32_0 = arith.constant 0 : i32
    %c0_i32_1 = arith.constant 0 : i32
    return %c0_i32, %c0_i32_0 : i32, i32
  }
  func.func @transform_5(%arg0: i32) -> (i32, i32) {
    %c0_i32 = arith.constant 0 : i32
    %c0_i32_0 = arith.constant 0 : i32
    return %arg0, %c0_i32 : i32, i32
  }
}

</mosaic_0001>

<bundles_post_ra>
// kernel: tpu_custom_call.1
= control target key start
LH: loop header
LB: loop body
LE: loop exit
PB: predicated region body
PF: predicated region fallthrough
CT: control target
= control target key end

     0   :  { %vm47_vm0 = vcmask 261120   ;;  %vm2383_vm1 = vcmask 130048   ;;  %s4010_s1 = inlined_call_operand.vmem [shape: f32[32,16], index: 1, kind: input, shape index: {}]   ;;  %s4011_s3 = inlined_call_operand.vmem [shape: f32[32,16], index: 3, kind: input, shape index: {}]   ;;  %s4012_s0 = inlined_call_operand.vmem [shape: f32[128,32], index: 0, kind: input, shape index: {}]   ;;  %s4013_s2 = inlined_call_operand.vmem [shape: f32[1,16], index: 2, kind: input, shape index: {}]   ;;  %s4014_s4 = inlined_call_operand.vmem [shape: f32[1,16], index: 4, kind: input, shape index: {}]   ;;  %s4015_s5 = inlined_call_operand.vmem [shape: f32[128,16], index: 5, kind: output, shape index: {}]  }
   0x1   :  { %v36_v0 = vld [vmem:[%s4010_s1] sm:$0xff]  ;;  %v37_v1 = vld [vmem:[%s4010_s1 + $0x8] sm:$0xff]  ;;  %v3363_v7 = vld [vmem:[%s4010_s1 + $0x10] sm:$0xff] }
   0x2   :  { %v1226_v2 = vld [vmem:[%s4011_s3] sm:$0xff]  ;;  %v97_v3 = vand.u32 4294901760, %v36_v0  ;;  %v100_v4 = vand.u32 4294901760, %v37_v1  ;;  %v1227_v5 = vld [vmem:[%s4011_s3 + $0x8] sm:$0xff]  ;;  %v3368_v8 = vld [vmem:[%s4010_s1 + $0x18] sm:$0xff]  ;;  %v103_v10 = vand.u32 4294901760, %v3363_v7 }
   0x3   :  { %v1238_v6 = vand.u32 4294901760, %v1226_v2  ;;  %v1241_v9 = vand.u32 4294901760, %v1227_v5  ;;  %v106_v11 = vand.u32 4294901760, %v3368_v8  ;;  %v3375_v12 = vld [vmem:[%s4011_s3 + $0x10] sm:$0xff]  ;;  %v3380_v13 = vld [vmem:[%s4011_s3 + $0x18] sm:$0xff]  ;;  %v20_v14 = vld [vmem:[%s4012_s0] sm:$0xff] }
   0x4   :  { %v3385_v15 = vpack.c.bf16 %v100_v4, %v97_v3  ;;  %v1244_v16 = vand.u32 4294901760, %v3375_v12  ;;  %v1247_v17 = vand.u32 4294901760, %v3380_v13  ;;  %v49_v18 = vsel %vm47_vm0, %v20_v14, 0  ;;  %v21_v19 = vld [vmem:[%s4012_s0 + $0x8] sm:$0xff]  ;;  %v22_v20 = vld [vmem:[%s4012_s0 + $0x10] sm:$0xff]  ;;  %v23_v29 = vld [vmem:[%s4012_s0 + $0x18] sm:$0xff] }
   0x5   :  { %v3396_v21 = vpack.c.bf16 %v1241_v9, %v1238_v6  ;;  %v3402_v22 = vpack.c.bf16 %v106_v11, %v103_v10  ;;  %v3404_v23 = vand.u32 4294901760, %v49_v18  ;;  %v52_v24 = vsel %vm47_vm0, %v21_v19, 0  ;;  %v24_v50 = vld [vmem:[%s4012_s0 + $0x20] sm:$0xff]  ;;  %v25_v55 = vld [vmem:[%s4012_s0 + $0x28] sm:$0xff]  ;;  %v26_v60 = vld [vmem:[%s4012_s0 + $0x30] sm:$0xff] }
   0x6   :  { %3031 = vmatprep.subr.bf16.mxu0 %v3385_v15  ;;  %v3412_v25 = vpack.c.bf16 %v1247_v17, %v1244_v16  ;;  %v3414_v26 = vand.u32 4294901760, %v52_v24  ;;  %v3416_v27 = vsub.f32 %v36_v0, %v97_v3  ;;  %v3418_v28 = vsub.f32 %v37_v1, %v100_v4  ;;  %v27_v61 = vld [vmem:[%s4012_s0 + $0x38] sm:$0xff] }
   0x7   :  { %3079 = vmatprep.subr.bf16.mxu1 %v3396_v21  ;;  %3033 = vmatpush3.bf16.msra.mxu0 %v3385_v15  ;;  %v3426_v30 = vsub.f32 %v49_v18, %v3404_v23  ;;  %v3428_v31 = vsub.f32 %v1226_v2, %v1238_v6  ;;  %v3430_v32 = vsub.f32 %v1227_v5, %v1241_v9  ;;  %v55_v33 = vsel %vm47_vm0, %v22_v20, 0  ;;  %v28_v6 = vld [vmem:[%s4012_s0 + $0x40] sm:$0xff]  ;;  %v29_v9 = vld [vmem:[%s4012_s0 + $0x48] sm:$0xff] }
   0x8   :  { %3081 = vmatpush3.bf16.msra.mxu1 %v3396_v21  ;;  %3035 = vmatprep.subr.bf16.mxu0 %v3402_v22  ;;  %v3436_v34 = vsub.f32 %v52_v24, %v3414_v26  ;;  %v4022_v35 = vand.u32 4294901760, %v3416_v27  ;;  %v4020_v36 = vand.u32 4294901760, %v3418_v28  ;;  %v3440_v37 = vand.u32 4294901760, %v55_v33 }
   0x9   :  { %3083 = vmatprep.subr.bf16.mxu1 %v3412_v25  ;;  %v3444_v38 = vand.u32 4294901760, %v3426_v30  ;;  %v4019_v39 = vand.u32 4294901760, %v3428_v31  ;;  %v4018_v40 = vand.u32 4294901760, %v3430_v32  ;;  %v58_v41 = vsel %vm47_vm0, %v23_v29, 0 }
   0xa   :  { %v3450_v42 = vand.u32 4294901760, %v3436_v34  ;;  %v329_v43 = vsub.f32 %v3416_v27, %v4022_v35  ;;  %v336_v44 = vsub.f32 %v3418_v28, %v4020_v36  ;;  %v3459_v45 = vsub.f32 %v55_v33, %v3440_v37 }
   0xb   :  { %3037 = vmatpush3.bf16.msra.mxu0 %v3402_v22  ;;  %v168_v46 = vsub.f32 %v3426_v30, %v3444_v38  ;;  %v1470_v47 = vsub.f32 %v3428_v31, %v4019_v39  ;;  %v1477_v48 = vsub.f32 %v3430_v32, %v4018_v40  ;;  %v3470_v49 = vand.u32 4294901760, %v58_v41 }
   0xc   :  { %3085 = vmatpush3.bf16.msra.mxu1 %v3412_v25  ;;  %v178_v51 = vsub.f32 %v3436_v34, %v3450_v42  ;;  %v330_v52 = vand.u32 4294901760, %v329_v43  ;;  %v337_v53 = vand.u32 4294901760, %v336_v44  ;;  %v3479_v54 = vand.u32 4294901760, %v3459_v45 }
   0xd   :  { %v169_v56 = vand.u32 4294901760, %v168_v46  ;;  %v1471_v57 = vand.u32 4294901760, %v1470_v47  ;;  %v1478_v58 = vand.u32 4294901760, %v1477_v48  ;;  %v3485_v59 = vsub.f32 %v58_v41, %v3470_v49 }
   0xe   :  { %v179_v62 = vand.u32 4294901760, %v178_v51  ;;  %v3038_v63 = vpack.c.bf16 %v337_v53, %v330_v52  ;;  %v188_v0 = vsub.f32 %v3459_v45, %v3479_v54  ;;  %v61_v1 = vsel %vm47_vm0, %v24_v50, 0 }
   0xf   :  { %2654 = vmatprep.mubr.f32.mxu0 %v169_v56  ;;  %2846 = vmatprep.mubr.f32.mxu1 %v169_v56  ;;  %v3086_v2 = vpack.c.bf16 %v1478_v58, %v1471_v57  ;;  %v3497_v3 = vand.u32 4294901760, %v3485_v59  ;;  %v3499_v4 = vand.u32 4294901760, %v61_v1  ;;  %v64_v5 = vsel %vm47_vm0, %v25_v55, 0 }
  0x10   :  { %2655 = vmatmul.mubr.f32.vlgmr.msra.gmra.mrb[0].mxu0 %v179_v62  ;;  %3039 = vmatprep.subr.bf16.mxu0 %v3038_v63  ;;  %v189_v14 = vand.u32 4294901760, %v188_v0  ;;  %v3508_v18 = vand.u32 4294901760, %v64_v5  ;;  %v67_v19 = vsel %vm47_vm0, %v26_v60, 0  ;;  %v70_v20 = vsel %vm47_vm0, %v27_v61, 0 }
  0x11   :  { %4047 = vst [vmem:[#allocation2_spill] sm:$0xff] %v3497_v3  ;;  %2847 = vmatmul.mubr.f32.vlgmr.msra.gmra.mrb[0].mxu1 %v179_v62  ;;  %3087 = vmatprep.subr.bf16.mxu1 %v3086_v2  ;;  %v198_v24 = vsub.f32 %v3485_v59, %v3497_v3  ;;  %v3515_v29 = vsub.f32 %v61_v1, %v3499_v4  ;;  %v3517_v33 = vand.u32 4294901760, %v67_v19  ;;  %v3519_v41 = vand.u32 4294901760, %v70_v20 }
  0x12   :  { %3041 = vmatpush3.bf16.msra.mxu0 %v3038_v63  ;;  %3089 = vmatpush3.bf16.msra.mxu1 %v3086_v2  ;;  %v3522_v43 = vsub.f32 %v64_v5, %v3508_v18  ;;  %v73_v44 = vsel %vm47_vm0, %v28_v6, 0  ;;  %v76_v46 = vsel %vm47_vm0, %v29_v9, 0  ;;  %v3529_v47 = vsub.f32 %v3363_v7, %v103_v10  ;;  %v30_v5 = vld [vmem:[%s4012_s0 + $0x50] sm:$0xff] }
  0x13   :  { %2657 = vmatprep.mubr.f32.mxu0 %v189_v14  ;;  %2849 = vmatprep.mubr.f32.mxu1 %v189_v14  ;;  %v199_v48 = vand.u32 4294901760, %v198_v24  ;;  %v3532_v50 = vand.u32 4294901760, %v3515_v29  ;;  %v3535_v51 = vsub.f32 %v67_v19, %v3517_v33  ;;  %v3538_v52 = vsub.f32 %v70_v20, %v3519_v41  ;;  %v31_v20 = vld [vmem:[%s4012_s0 + $0x58] sm:$0xff] }
  0x14   :  { %v3541_v53 = vand.u32 4294901760, %v3522_v43  ;;  %v3543_v55 = vand.u32 4294901760, %v73_v44  ;;  %v3545_v56 = vand.u32 4294901760, %v76_v46  ;;  %v4017_v7 = vand.u32 4294901760, %v3529_v47 }
  0x15   :  { %4048 = vst [vmem:[#allocation3_spill] sm:$0xff] %v3532_v50  ;;  %2658 = vmatmul.mubr.f32.gmra.mrb[2].mxu0 %v199_v48  ;;  %2850 = vmatmul.mubr.f32.gmra.mrb[2].mxu1 %v199_v48  ;;  %v208_v10 = vsub.f32 %v3515_v29, %v3532_v50  ;;  %v3551_v57 = vand.u32 4294901760, %v3535_v51  ;;  %v3554_v58 = vand.u32 4294901760, %v3538_v52  ;;  %v3559_v60 = vsub.f32 %v3368_v8, %v106_v11 }
  0x16   :  { %4049 = vst [vmem:[#allocation4_spill] sm:$0xff] %v3541_v53  ;;  %v218_v61 = vsub.f32 %v3522_v43, %v3541_v53  ;;  %v3564_v62 = vsub.f32 %v73_v44, %v3543_v55  ;;  %v3567_v63 = vsub.f32 %v76_v46, %v3545_v56  ;;  %v343_v0 = vsub.f32 %v3529_v47, %v4017_v7 }
  0x17   :  { %4050 = vst [vmem:[#allocation5_spill] sm:$0xff] %v3551_v57  ;;  %4051 = vst [vmem:[#allocation6_spill] sm:$0xff] %v3554_v58  ;;  %v209_v1 = vand.u32 4294901760, %v208_v10  ;;  %v228_v2 = vsub.f32 %v3535_v51, %v3551_v57  ;;  %v238_v8 = vsub.f32 %v3538_v52, %v3554_v58  ;;  %v4016_v11 = vand.u32 4294901760, %v3559_v60 }
  0x18   :  { %v219_v6 = vand.u32 4294901760, %v218_v61  ;;  %v3581_v9 = vand.u32 4294901760, %v3564_v62  ;;  %v3584_v14 = vand.u32 4294901760, %v3567_v63  ;;  %v344_v19 = vand.u32 4294901760, %v343_v0 }
  0x19   :  { %2660 = vmatprep.mubr.f32.mxu0 %v209_v1  ;;  %2852 = vmatprep.mubr.f32.mxu1 %v209_v1  ;;  %v229_v24 = vand.u32 4294901760, %v228_v2  ;;  %v239_v44 = vand.u32 4294901760, %v238_v8  ;;  %v350_v46 = vsub.f32 %v3559_v60, %v4016_v11  ;;  %v3595_v48 = vsub.f32 %v3375_v12, %v1244_v16  ;;  %v32_v12 = vld [vmem:[%s4012_s0 + $0x60] sm:$0xff] }
  0x1a   :  { %4052 = vst [vmem:[#allocation7_spill] sm:$0xff] %v3581_v9  ;;  %4053 = vst [vmem:[#allocation8_spill] sm:$0xff] %v3584_v14  ;;  %2661 = vmatmul.mubr.f32.gmra.mrb[4].mxu0 %v219_v6  ;;  %2853 = vmatmul.mubr.f32.gmra.mrb[4].mxu1 %v219_v6  ;;  %v248_v10 = vsub.f32 %v3564_v62, %v3581_v9  ;;  %v258_v61 = vsub.f32 %v3567_v63, %v3584_v14  ;;  %v79_v1 = vsel %vm47_vm0, %v30_v5, 0 }
  0x1b   :  { %v3604_v0 = vsub.f32 %v3380_v13, %v1247_v17  ;;  %2663 = vmatprep.mubr.f32.mxu0 %v229_v24  ;;  %2855 = vmatprep.mubr.f32.mxu1 %v229_v24  ;;  %v351_v16 = vand.u32 4294901760, %v350_v46  ;;  %v4021_v2 = vand.u32 4294901760, %v3595_v48  ;;  %v3611_v8 = vand.u32 4294901760, %v79_v1  ;;  %v33_v13 = vld [vmem:[%s4012_s0 + $0x68] sm:$0xff]  ;;  %v34_v24 = vld [vmem:[%s4012_s0 + $0x70] sm:$0xff] }
  0x1c   :  { %v82_v6 = vsel %vm47_vm0, %v31_v20, 0  ;;  %v249_v17 = vand.u32 4294901760, %v248_v10  ;;  %v259_v11 = vand.u32 4294901760, %v258_v61  ;;  %v85_v39 = vsel %vm47_vm0, %v32_v12, 0 }
  0x1d   :  { %v1490_v5 = vand.u32 4294901760, %v3604_v0  ;;  %v3618_v7 = vand.u32 4294901760, %v82_v6  ;;  %v3042_v46 = vpack.c.bf16 %v351_v16, %v344_v19  ;;  %v1484_v40 = vsub.f32 %v3595_v48, %v4021_v2  ;;  %v35_v16 = vld [vmem:[%s4012_s0 + $0x78] sm:$0xff] }
  0x1e   :  { %v3627_v20 = vsub.f32 %v79_v1, %v3611_v8  ;;  %2664 = vmatmul.mubr.f32.gmra.mrb[6].mxu0 %v239_v44  ;;  %2856 = vmatmul.mubr.f32.gmra.mrb[6].mxu1 %v239_v44  ;;  %v3634_v36 = vand.u32 4294901760, %v85_v39  ;;  %v88_v19 = vsel %vm47_vm0, %v33_v13, 0  ;;  %v91_v2 = vsel %vm47_vm0, %v34_v24, 0 }
  0x1f   :  { %v1491_v10 = vsub.f32 %v3604_v0, %v1490_v5  ;;  %v3632_v61 = vsub.f32 %v82_v6, %v3618_v7  ;;  %2666 = vmatprep.mubr.f32.mxu0 %v249_v17  ;;  %2858 = vmatprep.mubr.f32.mxu1 %v249_v17  ;;  %v1485_v1 = vand.u32 4294901760, %v1484_v40  ;;  %v3643_v44 = vand.u32 4294901760, %v88_v19 }
  0x20   :  { %v3641_v12 = vand.u32 4294901760, %v3627_v20  ;;  %3043 = vmatprep.subr.bf16.mxu0 %v3042_v46  ;;  %v3650_v13 = vsub.f32 %v85_v39, %v3634_v36  ;;  %v3652_v14 = vand.u32 4294901760, %v91_v2  ;;  %v94_v9 = vsel %vm47_vm0, %v35_v16, 0 }
  0x21   :  { %v1492_v6 = vand.u32 4294901760, %v1491_v10  ;;  %v3647_v35 = vand.u32 4294901760, %v3632_v61  ;;  %3045 = vmatpush3.bf16.msra.mxu0 %v3042_v46  ;;  %v3657_v17 = vsub.f32 %v88_v19, %v3643_v44  ;;  %v3046_v24 = vpack.c.bf16 %v3418_v28, %v3416_v27 }
  0x22   :  { %4054 = vst [vmem:[#allocation9_spill] sm:$0xff] %v3641_v12  ;;  %v268_v40 = vsub.f32 %v3627_v20, %v3641_v12  ;;  %2667 = vmatmul.mubr.f32.gmra.mrb[8].mxu0 %v259_v11  ;;  %2859 = vmatmul.mubr.f32.gmra.mrb[8].mxu1 %v259_v11  ;;  %v3665_v58 = vand.u32 4294901760, %v3650_v13  ;;  %v3668_v46 = vsub.f32 %v91_v2, %v3652_v14  ;;  %v3673_v16 = vand.u32 4294901760, %v94_v9 }
  0x23   :  { %4055 = vst [vmem:[#allocation10_spill] sm:$0xff] %v3647_v35  ;;  %v3090_v10 = vpack.c.bf16 %v1492_v6, %v1485_v1  ;;  %v278_v39 = vsub.f32 %v3632_v61, %v3647_v35  ;;  %v3671_v19 = vand.u32 4294901760, %v3657_v17  ;;  %3047 = vmatprep.subr.bf16.mxu0 %v3046_v24  ;;  %v3094_v11 = vpack.c.bf16 %v3430_v32, %v3428_v31 }
  0x24   :  { %4056 = vst [vmem:[#allocation11_spill] sm:$0xff] %v3665_v58  ;;  %v269_v12 = vand.u32 4294901760, %v268_v40  ;;  %v288_v6 = vsub.f32 %v3650_v13, %v3665_v58  ;;  %v3680_v35 = vand.u32 4294901760, %v3668_v46  ;;  %v3685_v40 = vsub.f32 %v94_v9, %v3673_v16 }
  0x25   :  { %4057 = vst [vmem:[#allocation12_spill] sm:$0xff] %v3671_v19  ;;  %3091 = vmatprep.subr.bf16.mxu1 %v3090_v10  ;;  %v279_v1 = vand.u32 4294901760, %v278_v39  ;;  %v298_v2 = vsub.f32 %v3657_v17, %v3671_v19  ;;  %v4059_v53 = vand.u32 4294901760, %v3416_v27  ;;  %v4060_v58 = vand.u32 4294901760, %v3418_v28 }
  0x26   :  { %4058 = vst [vmem:[#allocation13_spill] sm:$0xff] %v3680_v35  ;;  %3093 = vmatpush3.bf16.msra.mxu1 %v3090_v10  ;;  %2669 = vmatprep.mubr.f32.mxu0 %v269_v12  ;;  %v289_v57 = vand.u32 4294901760, %v288_v6  ;;  %v308_v39 = vsub.f32 %v3668_v46, %v3680_v35  ;;  %v4061_v10 = vand.u32 4294901760, %v3428_v31  ;;  %v4062_v3 = vand.u32 4294901760, %v3430_v32 }
  0x27   :  { %2861 = vmatprep.mubr.f32.mxu1 %v269_v12  ;;  %2670 = vmatmul.mubr.f32.gmra.mrb[10].mxu0 %v279_v1  ;;  %v3693_v50 = vpack.c.bf16 %v4060_v58, %v4059_v53  ;;  %v299_v9 = vand.u32 4294901760, %v298_v2  ;;  %v3702_v12 = vand.u32 4294901760, %v3685_v40  ;;  %v4063_v6 = vand.u32 4294901760, %v3529_v47 }
  0x28   :  { %v3699_v19 = vpack.c.bf16 %v4062_v3, %v4061_v10  ;;  %2862 = vmatmul.mubr.f32.gmra.mrb[10].mxu1 %v279_v1  ;;  %3095 = vmatprep.subr.bf16.mxu1 %v3094_v11  ;;  %v4064_v27 = vand.u32 4294901760, %v3559_v60  ;;  %v4065_v28 = vand.u32 4294901760, %v3595_v48  ;;  %v309_v31 = vand.u32 4294901760, %v308_v39 }
  0x29   :  { %2672 = vmatprep.mubr.f32.mxu0 %v289_v57  ;;  %2864 = vmatprep.mubr.f32.mxu1 %v289_v57  ;;  %v318_v32 = vsub.f32 %v3685_v40, %v3702_v12  ;;  %v3050_v58 = vpack.c.bf16 %v3559_v60, %v3529_v47  ;;  %v3098_v57 = vpack.c.bf16 %v3604_v0, %v3595_v48 }
  0x2a   :  { %v3708_v35 = vpack.c.bf16 %v4064_v27, %v4063_v6  ;;  %v3712_v53 = vpack.c.bf16 %v1490_v5, %v4065_v28 }
  0x2b   :  { %2673 = vmatmul.mubr.f32.gmra.mrb[12].mxu0 %v299_v9  ;;  %v319_v3 = vand.u32 4294901760, %v318_v32 }
  0x2c   :  { %2865 = vmatmul.mubr.f32.gmra.mrb[12].mxu1 %v299_v9  ;;  %2675 = vmatprep.mubr.f32.mxu0 %v309_v31  ;;  %v4076_v47 = vld [vmem:[#allocation12_spill] sm:$0xff] }
  0x2d   :  { %2867 = vmatprep.mubr.f32.mxu1 %v309_v31 }
  0x2f   :  { %2676 = vmatmul.mubr.f32.gmra.mrb[14].mxu0 %v319_v3 }
  0x30   :  { %2868 = vmatmul.mubr.f32.gmra.mrb[14].mxu1 %v319_v3  ;;  %2686 = vmatprep.mubr.f32.mxu0 %v3404_v23 }
  0x31   :  { %2878 = vmatprep.mubr.f32.mxu1 %v3404_v23 }
  0x33   :  { %2687 = vmatmul.mubr.f32.vlgmr.msra.gmra.mrb[0].mxu0 %v3414_v26 }
  0x34   :  { %2879 = vmatmul.mubr.f32.vlgmr.msra.gmra.mrb[0].mxu1 %v3414_v26  ;;  %3049 = vmatpush3.bf16.msra.mxu0 %v3046_v24 }
  0x35   :  { %3097 = vmatpush3.bf16.msra.mxu1 %v3094_v11  ;;  %2689 = vmatprep.mubr.f32.mxu0 %v3440_v37 }
  0x36   :  { %2881 = vmatprep.mubr.f32.mxu1 %v3440_v37  ;;  %3051 = vmatprep.subr.bf16.mxu0 %v3050_v58 }
  0x37   :  { %2690 = vmatmul.mubr.f32.gmra.mrb[2].mxu0 %v3470_v49  ;;  %3099 = vmatprep.subr.bf16.mxu1 %v3098_v57 }
  0x38   :  { %2882 = vmatmul.mubr.f32.gmra.mrb[2].mxu1 %v3470_v49  ;;  %2692 = vmatprep.mubr.f32.mxu0 %v3499_v4 }
  0x39   :  { %2884 = vmatprep.mubr.f32.mxu1 %v3499_v4  ;;  %3053 = vmatpush3.bf16.msra.mxu0 %v3050_v58 }
  0x3a   :  { %3101 = vmatpush3.bf16.msra.mxu1 %v3098_v57  ;;  %3055 = vmatprep.subr.bf16.mxu0 %v3385_v15 }
  0x3b   :  { %2693 = vmatmul.mubr.f32.gmra.mrb[4].mxu0 %v3508_v18  ;;  %3103 = vmatprep.subr.bf16.mxu1 %v3396_v21 }
  0x3c   :  { %2885 = vmatmul.mubr.f32.gmra.mrb[4].mxu1 %v3508_v18  ;;  %2695 = vmatprep.mubr.f32.mxu0 %v3517_v33 }
  0x3d   :  { %2887 = vmatprep.mubr.f32.mxu1 %v3517_v33 }
  0x3f   :  { %2696 = vmatmul.mubr.f32.gmra.mrb[6].mxu0 %v3519_v41 }
  0x40   :  { %2888 = vmatmul.mubr.f32.gmra.mrb[6].mxu1 %v3519_v41  ;;  %2698 = vmatprep.mubr.f32.mxu0 %v3543_v55 }
  0x41   :  { %2890 = vmatprep.mubr.f32.mxu1 %v3543_v55 }
  0x43   :  { %2699 = vmatmul.mubr.f32.gmra.mrb[8].mxu0 %v3545_v56 }
  0x44   :  { %2891 = vmatmul.mubr.f32.gmra.mrb[8].mxu1 %v3545_v56  ;;  %2701 = vmatprep.mubr.f32.mxu0 %v3611_v8 }
  0x45   :  { %2893 = vmatprep.mubr.f32.mxu1 %v3611_v8 }
  0x47   :  { %2702 = vmatmul.mubr.f32.gmra.mrb[10].mxu0 %v3618_v7 }
  0x48   :  { %2894 = vmatmul.mubr.f32.gmra.mrb[10].mxu1 %v3618_v7  ;;  %2704 = vmatprep.mubr.f32.mxu0 %v3634_v36 }
  0x49   :  { %2896 = vmatprep.mubr.f32.mxu1 %v3634_v36 }
  0x4b   :  { %2705 = vmatmul.mubr.f32.gmra.mrb[12].mxu0 %v3643_v44 }
  0x4c   :  { %2897 = vmatmul.mubr.f32.gmra.mrb[12].mxu1 %v3643_v44  ;;  %2707 = vmatprep.mubr.f32.mxu0 %v3652_v14 }
  0x4d   :  { %2899 = vmatprep.mubr.f32.mxu1 %v3652_v14 }
  0x4f   :  { %2708 = vmatmul.mubr.f32.gmra.mrb[14].mxu0 %v3673_v16 }
  0x50   :  { %2900 = vmatmul.mubr.f32.gmra.mrb[14].mxu1 %v3673_v16  ;;  %2718 = vmatprep.mubr.f32.mxu0 %v3426_v30 }
  0x51   :  { %2910 = vmatprep.mubr.f32.mxu1 %v3426_v30  ;;  %v4066_v30 = vld [vmem:[#allocation2_spill] sm:$0xff] }
  0x53   :  { %2719 = vmatmul.mubr.f32.vlgmr.msra.gmra.mrb[0].mxu0 %v3436_v34 }
  0x54   :  { %2911 = vmatmul.mubr.f32.vlgmr.msra.gmra.mrb[0].mxu1 %v3436_v34  ;;  %3057 = vmatpush3.bf16.msra.mxu0 %v3385_v15  ;;  %v4067_v34 = vld [vmem:[#allocation3_spill] sm:$0xff] }
  0x55   :  { %3105 = vmatpush3.bf16.msra.mxu1 %v3396_v21  ;;  %2721 = vmatprep.mubr.f32.mxu0 %v3459_v45 }
  0x56   :  { %2913 = vmatprep.mubr.f32.mxu1 %v3459_v45  ;;  %3059 = vmatprep.subr.bf16.mxu0 %v3402_v22  ;;  %v4070_v45 = vld [vmem:[#allocation6_spill] sm:$0xff] }
  0x57   :  { %2722 = vmatmul.mubr.f32.gmra.mrb[2].mxu0 %v3485_v59  ;;  %3107 = vmatprep.subr.bf16.mxu1 %v3412_v25 }
  0x58   :  { %2914 = vmatmul.mubr.f32.gmra.mrb[2].mxu1 %v3485_v59  ;;  %2724 = vmatprep.mubr.f32.mxu0 %v3515_v29  ;;  %v4073_v59 = vld [vmem:[#allocation9_spill] sm:$0xff] }
  0x59   :  { %2916 = vmatprep.mubr.f32.mxu1 %v3515_v29  ;;  %3061 = vmatpush3.bf16.msra.mxu0 %v3402_v22  ;;  %v4074_v29 = vld [vmem:[#allocation10_spill] sm:$0xff] }
  0x5a   :  { %3109 = vmatpush3.bf16.msra.mxu1 %v3412_v25  ;;  %3063 = vmatprep.subr.bf16.mxu0 %v3693_v50 }
  0x5b   :  { %2725 = vmatmul.mubr.f32.gmra.mrb[4].mxu0 %v3522_v43  ;;  %3111 = vmatprep.subr.bf16.mxu1 %v3699_v19 }
  0x5c   :  { %2917 = vmatmul.mubr.f32.gmra.mrb[4].mxu1 %v3522_v43  ;;  %2727 = vmatprep.mubr.f32.mxu0 %v3535_v51  ;;  %v4075_v43 = vld [vmem:[#allocation11_spill] sm:$0xff] }
  0x5d   :  { %2919 = vmatprep.mubr.f32.mxu1 %v3535_v51 }
  0x5f   :  { %2728 = vmatmul.mubr.f32.gmra.mrb[6].mxu0 %v3538_v52 }
  0x60   :  { %2920 = vmatmul.mubr.f32.gmra.mrb[6].mxu1 %v3538_v52  ;;  %2730 = vmatprep.mubr.f32.mxu0 %v3564_v62 }
  0x61   :  { %2922 = vmatprep.mubr.f32.mxu1 %v3564_v62 }
  0x63   :  { %2731 = vmatmul.mubr.f32.gmra.mrb[8].mxu0 %v3567_v63 }
  0x64   :  { %2923 = vmatmul.mubr.f32.gmra.mrb[8].mxu1 %v3567_v63  ;;  %2733 = vmatprep.mubr.f32.mxu0 %v3627_v20 }
  0x65   :  { %2925 = vmatprep.mubr.f32.mxu1 %v3627_v20 }
  0x67   :  { %2734 = vmatmul.mubr.f32.gmra.mrb[10].mxu0 %v3632_v61 }
  0x68   :  { %2926 = vmatmul.mubr.f32.gmra.mrb[10].mxu1 %v3632_v61  ;;  %2736 = vmatprep.mubr.f32.mxu0 %v3650_v13 }
  0x69   :  { %2928 = vmatprep.mubr.f32.mxu1 %v3650_v13 }
  0x6b   :  { %2737 = vmatmul.mubr.f32.gmra.mrb[12].mxu0 %v3657_v17 }
  0x6c   :  { %2929 = vmatmul.mubr.f32.gmra.mrb[12].mxu1 %v3657_v17  ;;  %2739 = vmatprep.mubr.f32.mxu0 %v3668_v46 }
  0x6d   :  { %2931 = vmatprep.mubr.f32.mxu1 %v3668_v46 }
  0x6f   :  { %2740 = vmatmul.mubr.f32.gmra.mrb[14].mxu0 %v3685_v40 }
  0x70   :  { %2932 = vmatmul.mubr.f32.gmra.mrb[14].mxu1 %v3685_v40  ;;  %2750 = vmatprep.mubr.f32.mxu0 %v3444_v38 }
  0x71   :  { %2942 = vmatprep.mubr.f32.mxu1 %v3444_v38  ;;  %v4068_v38 = vld [vmem:[#allocation4_spill] sm:$0xff] }
  0x73   :  { %2751 = vmatmul.mubr.f32.vlgmr.msra.gmra.mrb[0].mxu0 %v3450_v42 }
  0x74   :  { %2943 = vmatmul.mubr.f32.vlgmr.msra.gmra.mrb[0].mxu1 %v3450_v42  ;;  %3065 = vmatpush3.bf16.msra.mxu0 %v3693_v50  ;;  %v4069_v42 = vld [vmem:[#allocation5_spill] sm:$0xff] }
  0x75   :  { %3113 = vmatpush3.bf16.msra.mxu1 %v3699_v19  ;;  %2753 = vmatprep.mubr.f32.mxu0 %v3479_v54  ;;  %v4077_v50 = vld [vmem:[#allocation13_spill] sm:$0xff] }
  0x76   :  { %2945 = vmatprep.mubr.f32.mxu1 %v3479_v54  ;;  %3067 = vmatprep.subr.bf16.mxu0 %v3708_v35  ;;  %v4071_v54 = vld [vmem:[#allocation7_spill] sm:$0xff] }
  0x77   :  { %2754 = vmatmul.mubr.f32.gmra.mrb[2].mxu0 %v4066_v30  ;;  %3115 = vmatprep.subr.bf16.mxu1 %v3712_v53 }
  0x78   :  { %2946 = vmatmul.mubr.f32.gmra.mrb[2].mxu1 %v4066_v30  ;;  %2756 = vmatprep.mubr.f32.mxu0 %v4067_v34 }
  0x79   :  { %2948 = vmatprep.mubr.f32.mxu1 %v4067_v34  ;;  %3069 = vmatpush3.bf16.msra.mxu0 %v3708_v35  ;;  %v4072_v35 = vld [vmem:[#allocation8_spill] sm:$0xff] }
  0x7a   :  { %3117 = vmatpush3.bf16.msra.mxu1 %v3712_v53  ;;  %3071 = vmatprep.subr.bf16.mxu0 %v3385_v15 }
  0x7b   :  { %2757 = vmatmul.mubr.f32.gmra.mrb[4].mxu0 %v4068_v38  ;;  %3119 = vmatprep.subr.bf16.mxu1 %v3396_v21 }
  0x7c   :  { %2949 = vmatmul.mubr.f32.gmra.mrb[4].mxu1 %v4068_v38  ;;  %2759 = vmatprep.mubr.f32.mxu0 %v4069_v42 }
  0x7d   :  { %2951 = vmatprep.mubr.f32.mxu1 %v4069_v42 }
  0x7f   :  { %2760 = vmatmul.mubr.f32.gmra.mrb[6].mxu0 %v4070_v45 }
  0x80   :  { %2952 = vmatmul.mubr.f32.gmra.mrb[6].mxu1 %v4070_v45  ;;  %2762 = vmatprep.mubr.f32.mxu0 %v4071_v54 }
  0x81   :  { %2954 = vmatprep.mubr.f32.mxu1 %v4071_v54 }
  0x83   :  { %2763 = vmatmul.mubr.f32.gmra.mrb[8].mxu0 %v4072_v35 }
  0x84   :  { %2955 = vmatmul.mubr.f32.gmra.mrb[8].mxu1 %v4072_v35  ;;  %2765 = vmatprep.mubr.f32.mxu0 %v4073_v59 }
  0x85   :  { %2957 = vmatprep.mubr.f32.mxu1 %v4073_v59 }
  0x87   :  { %2766 = vmatmul.mubr.f32.gmra.mrb[10].mxu0 %v4074_v29 }
  0x88   :  { %2958 = vmatmul.mubr.f32.gmra.mrb[10].mxu1 %v4074_v29  ;;  %2768 = vmatprep.mubr.f32.mxu0 %v4075_v43 }
  0x89   :  { %2960 = vmatprep.mubr.f32.mxu1 %v4075_v43 }
  0x8b   :  { %2769 = vmatmul.mubr.f32.gmra.mrb[12].mxu0 %v4076_v47 }
  0x8c   :  { %2961 = vmatmul.mubr.f32.gmra.mrb[12].mxu1 %v4076_v47  ;;  %2771 = vmatprep.mubr.f32.mxu0 %v4077_v50 }
  0x8d   :  { %2963 = vmatprep.mubr.f32.mxu1 %v4077_v50 }
  0x8f   :  { %2772 = vmatmul.mubr.f32.gmra.mrb[14].mxu0 %v3702_v12 }
  0x90   :  { %2964 = vmatmul.mubr.f32.gmra.mrb[14].mxu1 %v3702_v12  ;;  %2782 = vmatprep.mubr.f32.mxu0 %v3404_v23 }
  0x91   :  { %2974 = vmatprep.mubr.f32.mxu1 %v3404_v23 }
  0x93   :  { %2783 = vmatmul.mubr.f32.vlgmr.msra.gmra.mrb[0].mxu0 %v3414_v26 }
  0x94   :  { %2975 = vmatmul.mubr.f32.vlgmr.msra.gmra.mrb[0].mxu1 %v3414_v26  ;;  %3073 = vmatpush3.bf16.msra.mxu0 %v3385_v15  ;;  %v3907_v15 = vld [vmem:[%s4013_s2] ss:$0 sm:$0xff] }
  0x95   :  { %3121 = vmatpush3.bf16.msra.mxu1 %v3396_v21  ;;  %2785 = vmatprep.mubr.f32.mxu0 %v3440_v37  ;;  %v3912_v21 = vld [vmem:[%s4014_s4] ss:$0 sm:$0xff] }
  0x96   :  { %2977 = vmatprep.mubr.f32.mxu1 %v3440_v37  ;;  %3075 = vmatprep.subr.bf16.mxu0 %v3402_v22 }
  0x97   :  { %2786 = vmatmul.mubr.f32.gmra.mrb[2].mxu0 %v3470_v49  ;;  %3123 = vmatprep.subr.bf16.mxu1 %v3412_v25 }
  0x98   :  { %2978 = vmatmul.mubr.f32.gmra.mrb[2].mxu1 %v3470_v49  ;;  %2788 = vmatprep.mubr.f32.mxu0 %v3499_v4 }
  0x99   :  { %2980 = vmatprep.mubr.f32.mxu1 %v3499_v4  ;;  %3077 = vmatpush3.bf16.msra.mxu0 %v3402_v22 }
  0x9a   :  { %3125 = vmatpush3.bf16.msra.mxu1 %v3412_v25 }
  0x9b   :  { %2789 = vmatmul.mubr.f32.gmra.mrb[4].mxu0 %v3508_v18 }
  0x9c   :  { %2981 = vmatmul.mubr.f32.gmra.mrb[4].mxu1 %v3508_v18  ;;  %2791 = vmatprep.mubr.f32.mxu0 %v3517_v33 }
  0x9d   :  { %2983 = vmatprep.mubr.f32.mxu1 %v3517_v33 }
  0x9f   :  { %2792 = vmatmul.mubr.f32.gmra.mrb[6].mxu0 %v3519_v41 }
  0xa0   :  { %2984 = vmatmul.mubr.f32.gmra.mrb[6].mxu1 %v3519_v41  ;;  %2794 = vmatprep.mubr.f32.mxu0 %v3543_v55 }
  0xa1   :  { %2986 = vmatprep.mubr.f32.mxu1 %v3543_v55 }
  0xa3   :  { %2795 = vmatmul.mubr.f32.gmra.mrb[8].mxu0 %v3545_v56 }
  0xa4   :  { %2987 = vmatmul.mubr.f32.gmra.mrb[8].mxu1 %v3545_v56  ;;  %2797 = vmatprep.mubr.f32.mxu0 %v3611_v8 }
  0xa5   :  { %2989 = vmatprep.mubr.f32.mxu1 %v3611_v8 }
  0xa7   :  { %2798 = vmatmul.mubr.f32.gmra.mrb[10].mxu0 %v3618_v7 }
  0xa8   :  { %2990 = vmatmul.mubr.f32.gmra.mrb[10].mxu1 %v3618_v7  ;;  %2800 = vmatprep.mubr.f32.mxu0 %v3634_v36 }
  0xa9   :  { %2992 = vmatprep.mubr.f32.mxu1 %v3634_v36 }
  0xab   :  { %2801 = vmatmul.mubr.f32.gmra.mrb[12].mxu0 %v3643_v44 }
  0xac   :  { %2993 = vmatmul.mubr.f32.gmra.mrb[12].mxu1 %v3643_v44  ;;  %2803 = vmatprep.mubr.f32.mxu0 %v3652_v14 }
  0xad   :  { %2995 = vmatprep.mubr.f32.mxu1 %v3652_v14 }
  0xaf   :  { %2804 = vmatmul.mubr.f32.gmra.mrb[14].mxu0 %v3673_v16 }
  0xb0   :  { %2996 = vmatmul.mubr.f32.gmra.mrb[14].mxu1 %v3673_v16  ;;  %2814 = vmatprep.mubr.f32.mxu0 %v3404_v23 }
  0xb1   :  { %3006 = vmatprep.mubr.f32.mxu1 %v3404_v23 }
  0xb3   :  { %2815 = vmatmul.mubr.f32.vlgmr.msra.gmra.mrb[0].mxu0 %v3414_v26 }
  0xb4   :  { %3007 = vmatmul.mubr.f32.vlgmr.msra.gmra.mrb[0].mxu1 %v3414_v26  ;;  %2817 = vmatprep.mubr.f32.mxu0 %v3440_v37 }
  0xb5   :  { %3009 = vmatprep.mubr.f32.mxu1 %v3440_v37 }
  0xb7   :  { %2818 = vmatmul.mubr.f32.gmra.mrb[2].mxu0 %v3470_v49 }
  0xb8   :  { %3010 = vmatmul.mubr.f32.gmra.mrb[2].mxu1 %v3470_v49  ;;  %2820 = vmatprep.mubr.f32.mxu0 %v3499_v4 }
  0xb9   :  { %3012 = vmatprep.mubr.f32.mxu1 %v3499_v4 }
  0xbb   :  { %2821 = vmatmul.mubr.f32.gmra.mrb[4].mxu0 %v3508_v18 }
  0xbc   :  { %3013 = vmatmul.mubr.f32.gmra.mrb[4].mxu1 %v3508_v18  ;;  %2823 = vmatprep.mubr.f32.mxu0 %v3517_v33 }
  0xbd   :  { %3015 = vmatprep.mubr.f32.mxu1 %v3517_v33 }
  0xbf   :  { %2824 = vmatmul.mubr.f32.gmra.mrb[6].mxu0 %v3519_v41 }
  0xc0   :  { %3016 = vmatmul.mubr.f32.gmra.mrb[6].mxu1 %v3519_v41  ;;  %2826 = vmatprep.mubr.f32.mxu0 %v3543_v55 }
  0xc1   :  { %3018 = vmatprep.mubr.f32.mxu1 %v3543_v55 }
  0xc3   :  { %2827 = vmatmul.mubr.f32.gmra.mrb[8].mxu0 %v3545_v56 }
  0xc4   :  { %3019 = vmatmul.mubr.f32.gmra.mrb[8].mxu1 %v3545_v56  ;;  %2829 = vmatprep.mubr.f32.mxu0 %v3611_v8 }
  0xc5   :  { %3021 = vmatprep.mubr.f32.mxu1 %v3611_v8 }
  0xc7   :  { %2830 = vmatmul.mubr.f32.gmra.mrb[10].mxu0 %v3618_v7 }
  0xc8   :  { %3022 = vmatmul.mubr.f32.gmra.mrb[10].mxu1 %v3618_v7  ;;  %2832 = vmatprep.mubr.f32.mxu0 %v3634_v36 }
  0xc9   :  { %3024 = vmatprep.mubr.f32.mxu1 %v3634_v36 }
  0xcb   :  { %2833 = vmatmul.mubr.f32.gmra.mrb[12].mxu0 %v3643_v44 }
  0xcc   :  { %3025 = vmatmul.mubr.f32.gmra.mrb[12].mxu1 %v3643_v44  ;;  %2835 = vmatprep.mubr.f32.mxu0 %v3652_v14 }
  0xcd   :  { %3027 = vmatprep.mubr.f32.mxu1 %v3652_v14 }
  0xcf   :  { %2836 = vmatmul.mubr.f32.gmra.mrb[14].mxu0 %v3673_v16 }
  0xd0   :  { %3028 = vmatmul.mubr.f32.gmra.mrb[14].mxu1 %v3673_v16 }
 0x186   :  { %v2816_v22 = vpop.f32.mrb[0].mxu0 }
 0x187   :  { %v3126_v23 = vadd.f32 %v2816_v22, %v3907_v15  ;;  %v3008_v25 = vpop.f32.mrb[0].mxu1  ;;  %v1132_v26 = vpop.f32.mrb[1].mxu0 }
 0x188   :  { %v3142_v36 = vadd.f32 %v3008_v25, %v3912_v21  ;;  %v3127_v37 = vadd.f32 %v3907_v15, %v1132_v26  ;;  %v2273_v49 = vpop.f32.mrb[1].mxu1 }
 0x189   :  { %v3143_v4 = vadd.f32 %v3912_v21, %v2273_v49 }
 0x18a   :  { %v2368_v18 = vmul.f32 %v3142_v36, %v3126_v23  ;;  %v2819_v33 = vpop.f32.mrb[2].mxu0 }
 0x18b   :  { %v2367_v41 = vmul.f32 %v3143_v4, %v3127_v37  ;;  %v3128_v51 = vadd.f32 %v2819_v33, %v3907_v15  ;;  %v3011_v52 = vpop.f32.mrb[2].mxu1  ;;  %v1144_v55 = vpop.f32.mrb[3].mxu0 }
 0x18c   :  { %2385 = vst.msk [vmem:[%s4015_s5 + $0x8] sm:$0xff] %vm2383_vm1, %v2368_v18  ;;  %v3144_v56 = vadd.f32 %v3011_v52, %v3912_v21  ;;  %v3129_v7 = vadd.f32 %v3907_v15, %v1144_v55  ;;  %v2285_v60 = vpop.f32.mrb[3].mxu1 }
 0x18d   :  { %2384 = vst.msk [vmem:[%s4015_s5] sm:$0xff] %vm2383_vm1, %v2367_v41  ;;  %v3145_v62 = vadd.f32 %v3912_v21, %v2285_v60 }
 0x18e   :  { %v2370_v63 = vmul.f32 %v3144_v56, %v3128_v51  ;;  %v2822_v14 = vpop.f32.mrb[4].mxu0 }
 0x18f   :  { %v2369_v48 = vmul.f32 %v3145_v62, %v3129_v7  ;;  %v3130_v0 = vadd.f32 %v2822_v14, %v3907_v15  ;;  %v3014_v8 = vpop.f32.mrb[4].mxu1  ;;  %v1156_v5 = vpop.f32.mrb[5].mxu0 }
 0x190   :  { %2387 = vst.msk [vmem:[%s4015_s5 + $0x18] sm:$0xff] %vm2383_vm1, %v2370_v63  ;;  %v3146_v20 = vadd.f32 %v3014_v8, %v3912_v21  ;;  %v3131_v61 = vadd.f32 %v3907_v15, %v1156_v5  ;;  %v2297_v44 = vpop.f32.mrb[5].mxu1 }
 0x191   :  { %2386 = vst.msk [vmem:[%s4015_s5 + $0x10] sm:$0xff] %vm2383_vm1, %v2369_v48  ;;  %v3147_v13 = vadd.f32 %v3912_v21, %v2297_v44 }
 0x192   :  { %v2372_v17 = vmul.f32 %v3146_v20, %v3130_v0  ;;  %v2825_v24 = vpop.f32.mrb[6].mxu0 }
 0x193   :  { %v2371_v46 = vmul.f32 %v3147_v13, %v3131_v61  ;;  %v3132_v19 = vadd.f32 %v2825_v24, %v3907_v15  ;;  %v3017_v16 = vpop.f32.mrb[6].mxu1  ;;  %v1168_v11 = vpop.f32.mrb[7].mxu0 }
 0x194   :  { %2389 = vst.msk [vmem:[%s4015_s5 + $0x28] sm:$0xff] %vm2383_vm1, %v2372_v17  ;;  %v3148_v1 = vadd.f32 %v3017_v16, %v3912_v21  ;;  %v3133_v2 = vadd.f32 %v3907_v15, %v1168_v11  ;;  %v2309_v40 = vpop.f32.mrb[7].mxu1 }
 0x195   :  { %2388 = vst.msk [vmem:[%s4015_s5 + $0x20] sm:$0xff] %vm2383_vm1, %v2371_v46  ;;  %v3149_v39 = vadd.f32 %v3912_v21, %v2309_v40 }
 0x196   :  { %v2374_v10 = vmul.f32 %v3148_v1, %v3132_v19  ;;  %v2828_v9 = vpop.f32.mrb[8].mxu0 }
 0x197   :  { %v2373_v12 = vmul.f32 %v3149_v39, %v3133_v2  ;;  %v3134_v6 = vadd.f32 %v2828_v9, %v3907_v15  ;;  %v3020_v27 = vpop.f32.mrb[8].mxu1  ;;  %v1180_v28 = vpop.f32.mrb[9].mxu0 }
 0x198   :  { %2391 = vst.msk [vmem:[%s4015_s5 + $0x38] sm:$0xff] %vm2383_vm1, %v2374_v10  ;;  %v3150_v53 = vadd.f32 %v3020_v27, %v3912_v21  ;;  %v3135_v31 = vadd.f32 %v3907_v15, %v1180_v28  ;;  %v2321_v32 = vpop.f32.mrb[9].mxu1 }
 0x199   :  { %2390 = vst.msk [vmem:[%s4015_s5 + $0x30] sm:$0xff] %vm2383_vm1, %v2373_v12  ;;  %v3151_v3 = vadd.f32 %v3912_v21, %v2321_v32 }
 0x19a   :  { %v2376_v58 = vmul.f32 %v3150_v53, %v3134_v6  ;;  %v2831_v57 = vpop.f32.mrb[10].mxu0 }
 0x19b   :  { %v2375_v30 = vmul.f32 %v3151_v3, %v3135_v31  ;;  %v3136_v34 = vadd.f32 %v2831_v57, %v3907_v15  ;;  %v3023_v38 = vpop.f32.mrb[10].mxu1  ;;  %v1192_v42 = vpop.f32.mrb[11].mxu0 }
 0x19c   :  { %2393 = vst.msk [vmem:[%s4015_s5 + $0x48] sm:$0xff] %vm2383_vm1, %v2376_v58  ;;  %v3152_v45 = vadd.f32 %v3023_v38, %v3912_v21  ;;  %v3137_v54 = vadd.f32 %v3907_v15, %v1192_v42  ;;  %v2333_v35 = vpop.f32.mrb[11].mxu1 }
 0x19d   :  { %2392 = vst.msk [vmem:[%s4015_s5 + $0x40] sm:$0xff] %vm2383_vm1, %v2375_v30  ;;  %v3153_v59 = vadd.f32 %v3912_v21, %v2333_v35 }
 0x19e   :  { %v2378_v29 = vmul.f32 %v3152_v45, %v3136_v34  ;;  %v2834_v43 = vpop.f32.mrb[12].mxu0 }
 0x19f   :  { %v2377_v47 = vmul.f32 %v3153_v59, %v3137_v54  ;;  %v3138_v50 = vadd.f32 %v2834_v43, %v3907_v15  ;;  %v3026_v22 = vpop.f32.mrb[12].mxu1  ;;  %v1204_v23 = vpop.f32.mrb[13].mxu0 }
 0x1a0   :  { %2395 = vst.msk [vmem:[%s4015_s5 + $0x58] sm:$0xff] %vm2383_vm1, %v2378_v29  ;;  %v3154_v25 = vadd.f32 %v3026_v22, %v3912_v21  ;;  %v3139_v26 = vadd.f32 %v3907_v15, %v1204_v23  ;;  %v2345_v36 = vpop.f32.mrb[13].mxu1 }
 0x1a1   :  { %2394 = vst.msk [vmem:[%s4015_s5 + $0x50] sm:$0xff] %vm2383_vm1, %v2377_v47  ;;  %v3155_v37 = vadd.f32 %v3912_v21, %v2345_v36 }
 0x1a2   :  { %v2380_v49 = vmul.f32 %v3154_v25, %v3138_v50  ;;  %v2837_v4 = vpop.f32.mrb[14].mxu0 }
 0x1a3   :  { %v2379_v18 = vmul.f32 %v3155_v37, %v3139_v26  ;;  %v3140_v33 = vadd.f32 %v2837_v4, %v3907_v15  ;;  %v3029_v41 = vpop.f32.mrb[14].mxu1  ;;  %v1216_v51 = vpop.f32.mrb[15].mxu0 }
 0x1a4   :  { %2397 = vst.msk [vmem:[%s4015_s5 + $0x68] sm:$0xff] %vm2383_vm1, %v2380_v49  ;;  %v3156_v52 = vadd.f32 %v3029_v41, %v3912_v21  ;;  %v3141_v55 = vadd.f32 %v3907_v15, %v1216_v51  ;;  %v2357_v56 = vpop.f32.mrb[15].mxu1 }
 0x1a5   :  { %2396 = vst.msk [vmem:[%s4015_s5 + $0x60] sm:$0xff] %vm2383_vm1, %v2379_v18  ;;  %v3157_v7 = vadd.f32 %v3912_v21, %v2357_v56 }
 0x1a6   :  { %v2382_v60 = vmul.f32 %v3156_v52, %v3140_v33 }
 0x1a7   :  { %v2381_v62 = vmul.f32 %v3157_v7, %v3141_v55 }
 0x1a8   :  { %2399 = vst.msk [vmem:[%s4015_s5 + $0x78] sm:$0xff] %vm2383_vm1, %v2382_v60 }
 0x1a9   :  { %2398 = vst.msk [vmem:[%s4015_s5 + $0x70] sm:$0xff] %vm2383_vm1, %v2381_v62 }

</bundles_post_ra>
